<compile_context>
chip_gen: v6e
topology: v6e:2x2x1
jax: 0.10.0
libtpu: 0.0.40
codegen_flags: <defaults>
</compile_context>

<pallas_src>
import functools

import jax
import jax.numpy as jnp
from jax.experimental import pallas as pl
from jax.experimental.pallas import tpu as pltpu

_LANE = 128
_SUBLANE_BF16 = 16
# Conservative planning budget / limit that fit every generation (v7x has only
# 64 MiB physical VMEM per TensorCore; v5e/v6e have 128 MiB).
_PLAN_VMEM_BUDGET = 32 * 1024 * 1024
_VMEM_LIMIT_BYTES = 48 * 1024 * 1024


def _round_up(a, b):
    return (a + b - 1) // b * b


def _stable_sigmoid(z):
    # exp of a non-positive argument never overflows; both exp and the
    # approximate reciprocal go to the EUP slot (free under the MXU).
    e = jnp.exp(-jnp.abs(z))
    inv = pl.reciprocal(1.0 + e, approx=True)
    return jnp.where(z >= 0, inv, e * inv)


# ---------------------------------------------------------------------------
# Kernels
# ---------------------------------------------------------------------------
def _mlp_kernel_single(x_ref, w_ref, b_ref, o_ref, *, activation: bool):
    """Single-pass: tk == full K. No accumulator; write straight to o_ref."""
    z = jnp.dot(x_ref[...], w_ref[...], preferred_element_type=jnp.float32)
    z = z + b_ref[...]                       # bias broadcasts over rows (f32)
    if activation:
        z = _stable_sigmoid(z)
    o_ref[...] = z.astype(o_ref.dtype)


def _mlp_kernel_ktiled(x_ref, w_ref, b_ref, o_ref, acc_ref, *, activation: bool):
    """K-tiled fallback: f32 VMEM accumulator with pl.when init/flush."""
    k = pl.program_id(2)

    @pl.when(k == 0)
    def _():
        acc_ref[...] = jnp.zeros_like(acc_ref)

    acc_ref[...] += jnp.dot(x_ref[...], w_ref[...],
                            preferred_element_type=jnp.float32)

    @pl.when(k == pl.num_programs(2) - 1)
    def _():
        z = acc_ref[...] + b_ref[...]
        if activation:
            z = _stable_sigmoid(z)
        o_ref[...] = z.astype(o_ref.dtype)


# ---------------------------------------------------------------------------
# One-time parameter prep (hoisted out of the per-call path)
# ---------------------------------------------------------------------------
def prepare_params(weight, bias, *, compute_dtype=jnp.bfloat16):
    """Transpose the PyTorch (n_out, n_in) weight to (K, N), zero-pad both the
    weight and bias to lane (128) multiples and cast the weight to the MXU
    compute dtype.  Call ONCE at parameter-init time, not per forward."""
    n_out, n_in = weight.shape
    assert bias.shape == (n_out,)
    Kp = _round_up(n_in, _LANE)
    Np = _round_up(n_out, _LANE)
    w_kn = jnp.pad(weight.T, ((0, Kp - n_in), (0, Np - n_out))).astype(compute_dtype)
    b_row = jnp.pad(bias, (0, Np - n_out)).astype(jnp.float32).reshape(1, Np)
    return w_kn, b_row, n_in, n_out


# ---------------------------------------------------------------------------
# Forward
# ---------------------------------------------------------------------------
def mlp_forward(x, w_kn, b_row, n_in, n_out, *, activation=False,
                out_dtype=None, tm=None, tn=None, tk=None,
                core_parallel_m=False):
    """y = sigmoid?(x @ W^T + b) with prepared params (w_kn: (Kp, Np) bf16)."""
    B, n_in_x = x.shape
    assert n_in_x == n_in
    Kp, Np = w_kn.shape
    compute_dtype = w_kn.dtype
    out_dtype = out_dtype or x.dtype
    out_bytes = jnp.dtype(out_dtype).itemsize
    c_bytes = jnp.dtype(compute_dtype).itemsize

    # --- M tiling: cover round_up(B, 16) with one tile when possible so x
    # padding (and wasted M work) stays minimal.
    if tm is None:
        tm = min(512, _round_up(B, _SUBLANE_BF16))
    M = _round_up(B, tm)

    # --- N / K plan: prefer single-pass (tk == Kp, resident weight), fall back
    # to K-tiled accumulation when the weight strip doesn't fit the budget.
    def _fits(tn_, tk_, with_acc):
        xb = 2 * tm * tk_ * c_bytes          # double-buffered x tile
        wb = 2 * tk_ * tn_ * c_bytes         # weight tile (counted dbuf, conservative)
        ob = 2 * tm * tn_ * out_bytes        # double-buffered out tile
        bb = 2 * tn_ * 4                     # bias
        ab = tm * tn_ * 4 if with_acc else 0
        return xb + wb + ob + bb + ab <= _PLAN_VMEM_BUDGET

    if tn is None or tk is None:
        chosen = None
        for tn_c in [Np] + [t for t in (1024, 512, 256, 128)
                            if t < Np and Np % t == 0]:
            if _fits(tn_c, Kp, with_acc=False):
                chosen = (tn_c, Kp)
                break
        if chosen is None:
            for tn_c in (256, 128):
                if Np % tn_c:
                    continue
                for tk_c in (t for t in (2048, 1024, 512, 256, 128)
                             if t < Kp and Kp % t == 0):
                    if _fits(tn_c, tk_c, with_acc=True):
                        chosen = (tn_c, tk_c)
                        break
                if chosen is not None:
                    break
        if chosen is None:
            chosen = (128, 128)              # always fits
        tn = tn if tn is not None else chosen[0]
        tk = tk if tk is not None else chosen[1]

    assert Np % tn == 0 and Kp % tk == 0
    assert tn % _LANE == 0 and tk % _LANE == 0 and tm % 8 == 0

    # Per-call x: pad once (zeros contribute nothing to the dot) and cast to
    # the bf16 compute dtype. Weight/bias were prepped once, outside this path.
    x_p = x
    if (M, Kp) != (B, n_in):
        x_p = jnp.pad(x, ((0, M - B), (0, Kp - n_in)))
    x_p = x_p.astype(compute_dtype)

    cost = pl.CostEstimate(
        flops=2 * M * Np * Kp,
        transcendentals=(M * Np) if activation else 0,
        bytes_accessed=(M * Kp * c_bytes + Kp * Np * c_bytes
                        + Np * 4 + M * Np * out_bytes),
    )

    # On v7x, core_parallel_m=True shards the M grid axis across the 2 TCs.
    m_sem = pltpu.CORE_PARALLEL if core_parallel_m else "parallel"

    if tk == Kp:
        # Single-pass kernel: no K grid axis, no accumulator scratch; the
        # weight block index map is constant in i (resident when Np == tn).
        grid = (M // tm, Np // tn)
        kernel = functools.partial(_mlp_kernel_single, activation=activation)
        grid_spec = pltpu.PrefetchScalarGridSpec(
            num_scalar_prefetch=0,
            grid=grid,
            in_specs=[
                pl.BlockSpec((tm, Kp), lambda i, j: (i, 0)),   # x
                pl.BlockSpec((Kp, tn), lambda i, j: (0, j)),   # W (K, N)
                pl.BlockSpec((1, tn), lambda i, j: (0, j)),    # bias row
            ],
            out_specs=pl.BlockSpec((tm, tn), lambda i, j: (i, j)),
        )
        semantics = (m_sem, "parallel")
    else:
        grid = (M // tm, Np // tn, Kp // tk)
        kernel = functools.partial(_mlp_kernel_ktiled, activation=activation)
        grid_spec = pltpu.PrefetchScalarGridSpec(
            num_scalar_prefetch=0,
            grid=grid,
            in_specs=[
                pl.BlockSpec((tm, tk), lambda i, j, k: (i, k)),   # x
                pl.BlockSpec((tk, tn), lambda i, j, k: (k, j)),   # W (K, N)
                pl.BlockSpec((1, tn), lambda i, j, k: (0, j)),    # bias row
            ],
            out_specs=pl.BlockSpec((tm, tn), lambda i, j, k: (i, j)),
            scratch_shapes=[pltpu.VMEM((tm, tn), jnp.float32)],
        )
        semantics = (m_sem, "parallel", "arbitrary")

    out_padded = pl.pallas_call(
        kernel,
        out_shape=jax.ShapeDtypeStruct((M, Np), out_dtype),
        grid_spec=grid_spec,
        compiler_params=pltpu.CompilerParams(
            dimension_semantics=semantics,
            vmem_limit_bytes=_VMEM_LIMIT_BYTES,
        ),
        cost_estimate=cost,
    )(x_p, w_kn, b_row)

    if (M, Np) == (B, n_out):
        return out_padded
    return out_padded[:B, :n_out]


if __name__ == "__main__":
    # Small shapes consistent with the module: batch=8, n_in=32, n_out=16.
    B, N_IN, N_OUT = 8, 32, 16

    key = jax.random.PRNGKey(0)
    kx, kw, kb = jax.random.split(key, 3)
    bound = 1.0 / (N_IN ** 0.5)
    x = jax.random.normal(kx, (B, N_IN), dtype=jnp.float32)
    weight = jax.random.uniform(kw, (N_OUT, N_IN), minval=-bound, maxval=bound,
                                dtype=jnp.float32)
    bias = jax.random.uniform(kb, (N_OUT,), minval=-bound, maxval=bound,
                              dtype=jnp.float32)

    # One-time parameter prep (transpose + pad + bf16 cast).
    w_kn, b_row, n_in, n_out = prepare_params(weight, bias)

    # Sigmoid branch (single-pass resident-weight plan).
    y = mlp_forward(x, w_kn, b_row, n_in, n_out, activation=True)
    jax.block_until_ready(y)
    y_ref = jax.nn.sigmoid(x @ weight.T + bias)
    assert y.shape == (B, N_OUT)
    # bf16 MXU operands + approx-reciprocal sigmoid -> ~1e-2 tolerance.
    assert jnp.allclose(y, y_ref, atol=3e-2, rtol=3e-2)

    # Identity (no-activation) branch.
    y2 = mlp_forward(x, w_kn, b_row, n_in, n_out, activation=False)
    jax.block_until_ready(y2)
    assert jnp.allclose(y2, x @ weight.T + bias, atol=5e-2, rtol=5e-2)

    # Larger shapes: exercise the K-tiled accumulator path (explicit tiles,
    # grid (2, 2, 3)) and the auto single-pass plan on the same data.
    B2, NI2, NO2 = 256, 384, 200
    kx2, kw2, kb2 = jax.random.split(jax.random.PRNGKey(1), 3)
    bound2 = 1.0 / (NI2 ** 0.5)
    x2 = jax.random.normal(kx2, (B2, NI2), dtype=jnp.float32)
    w2 = jax.random.uniform(kw2, (NO2, NI2), minval=-bound2, maxval=bound2,
                            dtype=jnp.float32)
    b2 = jax.random.uniform(kb2, (NO2,), minval=-bound2, maxval=bound2,
                            dtype=jnp.float32)
    w2_kn, b2_row, ni2, no2 = prepare_params(w2, b2)
    y3_ref = jax.nn.sigmoid(x2 @ w2.T + b2)

    y3 = mlp_forward(x2, w2_kn, b2_row, ni2, no2, activation=True,
                     tm=128, tn=128, tk=128)
    jax.block_until_ready(y3)
    assert y3.shape == (B2, NO2)
    assert jnp.allclose(y3, y3_ref, atol=5e-2, rtol=5e-2)

    y4 = mlp_forward(x2, w2_kn, b2_row, ni2, no2, activation=True)
    jax.block_until_ready(y4)
    assert jnp.allclose(y4, y3_ref, atol=5e-2, rtol=5e-2)

    print("KERNEL_OK")
</pallas_src>

<mosaic_0001>
module attributes {stable_mosaic.version = 11 : i64} {
  func.func @_mlp_kernel_single(%arg0: i32, %arg1: i32, %arg2: memref<16x128xbf16, #tpu.memory_space<vmem>>, %arg3: memref<128x128xbf16, #tpu.memory_space<vmem>>, %arg4: memref<1x128xf32, #tpu.memory_space<vmem>>, %arg5: memref<16x128xf32, #tpu.memory_space<vmem>>) attributes {dimension_semantics = [#tpu.dimension_semantics<parallel>, #tpu.dimension_semantics<parallel>], iteration_bounds = array<i64: 1, 1>, scalar_prefetch = 0 : i64, scratch_operands = 0 : i64, tpu.core_type = #tpu.core_type<tc>, window_params = [{transform_indices = @transform_0, window_bounds = array<i64: 16, 128>}, {transform_indices = @transform_1, window_bounds = array<i64: 128, 128>}, {transform_indices = @transform_2, window_bounds = array<i64: 1, 128>}, {transform_indices = @transform_3, window_bounds = array<i64: 16, 128>}]} {
    %c0 = arith.constant 0 : index
    %c0_0 = arith.constant 0 : index
    %0 = vector.load %arg2[%c0, %c0_0] : memref<16x128xbf16, #tpu.memory_space<vmem>>, vector<16x128xbf16>
    %c0_1 = arith.constant 0 : index
    %c0_2 = arith.constant 0 : index
    %1 = vector.load %arg3[%c0_1, %c0_2] : memref<128x128xbf16, #tpu.memory_space<vmem>>, vector<128x128xbf16>
    %cst = arith.constant dense<0.000000e+00> : vector<16x128xf32>
    %2 = tpu.matmul %0, %1, %cst {dimension_numbers = #tpu.dot_dimension_numbers<[1], [0], [0], [1], [0, 0, 1, 1], [], []>} : vector<16x128xbf16>, vector<128x128xbf16>, vector<16x128xf32> -> vector<16x128xf32>
    %c0_3 = arith.constant 0 : index
    %c0_4 = arith.constant 0 : index
    %3 = vector.load %arg4[%c0_3, %c0_4] : memref<1x128xf32, #tpu.memory_space<vmem>>, vector<1x128xf32>
    %4 = vector.broadcast %3 : vector<1x128xf32> to vector<16x128xf32>
    %5 = arith.addf %2, %4 : vector<16x128xf32>
    %6 = math.absf %5 : vector<16x128xf32>
    %cst_5 = arith.constant 0.000000e+00 : f32
    %7 = vector.broadcast %cst_5 : f32 to vector<16x128xf32>
    %8 = arith.subf %7, %6 : vector<16x128xf32>
    %9 = math.exp %8 : vector<16x128xf32>
    %cst_6 = arith.constant 1.000000e+00 : f32
    %10 = vector.broadcast %cst_6 : f32 to vector<16x128xf32>
    %11 = arith.addf %10, %9 : vector<16x128xf32>
    %12 = tpu.reciprocal %11 {approx = true} : vector<16x128xf32> -> vector<16x128xf32>
    %cst_7 = arith.constant 0.000000e+00 : f32
    %13 = vector.broadcast %cst_7 : f32 to vector<16x128xf32>
    %14 = arith.cmpf oge, %5, %13 : vector<16x128xf32>
    %15 = arith.mulf %9, %12 : vector<16x128xf32>
    %16 = arith.select %14, %12, %15 : vector<16x128xi1>, vector<16x128xf32>
    %c0_8 = arith.constant 0 : index
    %c0_9 = arith.constant 0 : index
    %17 = vector.load %arg5[%c0_8, %c0_9] : memref<16x128xf32, #tpu.memory_space<vmem>>, vector<16x128xf32>
    tpu.vector_store %arg5[%c0_8, %c0_9], %16 {strides = array<i32>} : memref<16x128xf32, #tpu.memory_space<vmem>>, vector<16x128xf32>,
    return
  }
  func.func @transform_0(%arg0: i32, %arg1: i32) -> (i32, i32) {
    %c0_i32 = arith.constant 0 : i32
    %c0_i32_0 = arith.constant 0 : i32
    return %arg0, %c0_i32 : i32, i32
  }
  func.func @transform_1(%arg0: i32, %arg1: i32) -> (i32, i32) {
    %c0_i32 = arith.constant 0 : i32
    %c0_i32_0 = arith.constant 0 : i32
    return %c0_i32, %arg1 : i32, i32
  }
  func.func @transform_2(%arg0: i32, %arg1: i32) -> (i32, i32) {
    %c0_i32 = arith.constant 0 : i32
    %c0_i32_0 = arith.constant 0 : i32
    return %c0_i32, %arg1 : i32, i32
  }
  func.func @transform_3(%arg0: i32, %arg1: i32) -> (i32, i32) {
    %c0_i32 = arith.constant 0 : i32
    return %arg0, %arg1 : i32, i32
  }
}

</mosaic_0001>

<bundles_post_ra>
// kernel: tpu_custom_call.1
= control target key start
LH: loop header
LB: loop body
LE: loop exit
PB: predicated region body
PF: predicated region fallthrough
CT: control target
= control target key end

     0   :  { %8 = vsyncpa [#allocation3], 0  ;;  %s374_s0 = inlined_call_operand.hbm [shape: bf16[16,128], index: 0, kind: input, shape index: {}]   ;;  %s375_s1 = inlined_call_operand.hbm [shape: bf16[128,128], index: 1, kind: input, shape index: {}]   ;;  %s376_s2 = inlined_call_operand.vmem [shape: f32[1,128], index: 2, kind: input, shape index: {}]   ;;  %s377_s3 = inlined_call_operand.hbm [shape: f32[16,128], index: 3, kind: output, shape index: {}]  }
   0x1   :  { %9 = vsyncpa [#allocation6], 0 }
   0x2   :  { %10 = vsyncpa [#allocation4], 0  ;;  %s333_s12 = smov [#allocation2]  }
   0x3   :  { %s16_s13 = sshll.u32 %s333_s12, 4  ;;  %s17_s13 = int_to_ptr.vmem [resolvable:$true] %s16_s13 }
   0x4   :  { %s275_s14 = scalar_lea.vmem %s17_s13, 128  ;;  %p280_p1 = scmp.lt.s32.totalorder %s17_s13, %s17_s13 }
   0x5   :  { %p276_p0 = scmp.ne.s32.totalorder %s17_s13, %s275_s14  ;;  %p281_p2 = scmp.lt.s32.totalorder %s275_s14, %s275_s14 }
   0x7   :  { %p282_p3 = por %p281_p2, %p280_p1 }
   0x9   :  { %p283_p4 = pnand %p282_p3, %p276_p0 }
   0xb   :  { %286 = shalt.err (!%p283_p4)
}
   0xc   :  { %s334_s15 = smov 64   ;;  %s335_s16 = smov 4  }
   0xd   :  { %22 = dma.hbm_to_vmem [thread:$0]  %s374_s0, 128, %s17_s13, [#allocation3], %s334_s15, %s334_s15, %s335_s16  }
   0xe   :  { %s336_s19 = smov [#allocation5]  }
   0xf   :  { %s28_s20 = sshll.u32 %s336_s19, 4  ;;  %s29_s20 = int_to_ptr.vmem [resolvable:$true] %s28_s20 }
  0x10   :  { %s295_s21 = scalar_lea.vmem %s29_s20, 1024  ;;  %p300_p6 = scmp.lt.s32.totalorder %s29_s20, %s29_s20 }
  0x11   :  { %p296_p5 = scmp.ne.s32.totalorder %s29_s20, %s295_s21  ;;  %p301_p7 = scmp.lt.s32.totalorder %s295_s21, %s295_s21 }
  0x13   :  { %p302_p8 = por %p301_p7, %p300_p6 }
  0x15   :  { %p303_p9 = pnand %p302_p8, %p296_p5 }
  0x17   :  { %306 = shalt.err (!%p303_p9)
}
  0x18   :  { %34 = dma.hbm_to_vmem [thread:$0]  %s375_s1, 1024, %s29_s20, [#allocation6], %s334_s15, %s334_s15, %s335_s16  }
  0x19   :  { %327 = dma.done.wait [#allocation3], 128  }
  0x1a   :  { %328 = vsyncadd [#allocation3], 4294967168 }
  0x1b   :  { %329 = dma.done.wait [#allocation6], 1024  }
  0x1c   :  { %330 = vsyncadd [#allocation6], 4294966272  ;;  %v337_v0 = vmov 0.0   ;;  %vm338_vm0 = vmmov 0   ;;  %v250_v1 = vld [vmem:[#allocation5 + $0x38] sm:$0xff]   ;;  %v251_v2 = vld [vmem:[#allocation5 + $0x30] sm:$0xff]  }
  0x1d   :  { %221 = vmatprep.subr.bf16.mxu0 %v337_v0  ;;  %237 = vmatprep.mubr.msk.bf16.mxu0 %vm338_vm0, %v337_v0  ;;  %v252_v3 = vld [vmem:[#allocation5 + $0x28] sm:$0xff]   ;;  %v253_v4 = vld [vmem:[#allocation5 + $0x20] sm:$0xff]   ;;  %v254_v5 = vld [vmem:[#allocation5 + $0x18] sm:$0xff]  }
  0x1e   :  { %222 = vmatpush3.bf16.msra.mxu0 %v250_v1  ;;  %v255_v6 = vld [vmem:[#allocation5 + $0x10] sm:$0xff]   ;;  %v256_v7 = vld [vmem:[#allocation5 + $0x8] sm:$0xff]   ;;  %v257_v8 = vld [vmem:[#allocation5] sm:$0xff]  }
  0x1f   :  { %223 = vmatprep.subr.bf16.mxu0 %v337_v0  ;;  %v258_v9 = vld [vmem:[#allocation2] sm:$0xff]  }
  0x20   :  { %v202_v10 = vld [vmem:[%s376_s2] ss:$0 sm:$0xff]  ;;  %s339_s2 = smov [#allocation7]  }
  0x21   :  { %s189_s24 = sshll.u32 %s339_s2, 4  ;;  %s190_s24 = int_to_ptr.vmem [resolvable:$true] %s189_s24 }
  0x22   :  { %224 = vmatpush3.bf16.msra.mxu0 %v251_v2  ;;  %s307_s25 = scalar_lea.vmem %s190_s24, 256  ;;  %p312_p11 = scmp.lt.s32.totalorder %s190_s24, %s190_s24 }
  0x23   :  { %225 = vmatprep.subr.bf16.mxu0 %v337_v0  ;;  %p308_p10 = scmp.ne.s32.totalorder %s190_s24, %s307_s25  ;;  %p313_p12 = scmp.lt.s32.totalorder %s307_s25, %s307_s25 }
  0x25   :  { %p314_p13 = por %p313_p12, %p312_p11 }
  0x26   :  { %226 = vmatpush3.bf16.msra.mxu0 %v252_v3 }
  0x27   :  { %227 = vmatprep.subr.bf16.mxu0 %v337_v0  ;;  %p315_p0 = pnand %p314_p13, %p308_p10 }
  0x2a   :  { %228 = vmatpush3.bf16.msra.mxu0 %v253_v4 }
  0x2b   :  { %229 = vmatprep.subr.bf16.mxu0 %v337_v0 }
  0x2e   :  { %230 = vmatpush3.bf16.msra.mxu0 %v254_v5 }
  0x2f   :  { %231 = vmatprep.subr.bf16.mxu0 %v337_v0 }
  0x32   :  { %232 = vmatpush3.bf16.msra.mxu0 %v255_v6 }
  0x33   :  { %233 = vmatprep.subr.bf16.mxu0 %v337_v0 }
  0x36   :  { %234 = vmatpush3.bf16.msra.mxu0 %v256_v7 }
  0x37   :  { %235 = vmatprep.subr.bf16.mxu0 %v337_v0 }
  0x3a   :  { %236 = vmatpush3.bf16.msra.mxu0 %v257_v8 }
  0x3d   :  { %238 = vmatmul.mubr.bf16.vlgmr.msra.gmra.mxu0 %v258_v9 }
  0xfd   :  { %v157_v11 = vpop.f32.mrf.mxu0 }
  0xfe   :  { %v158_v12 = vadd.f32 %v202_v10, %v157_v11 }
  0xff   :  { %v239_v13 = vpop.f32.mrf.mxu0 }
 0x100   :  { %v164_v14 = vand.u32 2147483647, %v158_v12  ;;  %vm176_vm1 = vcmp.ge.f32.partialorder %v158_v12, 0.0 }
 0x101   :  { %v160_v15 = vpop.f32.mrf.mxu0 }
 0x102   :  { %v166_v16 = vsub.f32 0.0, %v164_v14  ;;  %v161_v17 = vadd.f32 %v202_v10, %v160_v15 }
 0x103   :  { %v240_v18 = vpop.f32.mrf.mxu0 }
 0x104   :  { %v168_v19 = vmul.f32 1.442695, %v166_v16  ;;  %v165_v20 = vand.u32 2147483647, %v161_v17  ;;  %vm177_vm2 = vcmp.ge.f32.partialorder %v161_v17, 0.0 }
 0x106   :  { %259 = vpow2.f32 %v168_v19  ;;  %v167_v21 = vsub.f32 0.0, %v165_v20 }
 0x108   :  { %v170_v22 = vmul.f32 1.442695, %v167_v21 }
 0x10a   :  { %261 = vpow2.f32 %v170_v22 }
 0x113   :  { %v260_v23 = vpop.eup %259 }
 0x114   :  { %v172_v24 = vadd.f32 1.0, %v260_v23 }
 0x116   :  { %263 = vrcp.f32 %v172_v24 }
 0x117   :  { %v262_v25 = vpop.eup %261 }
 0x118   :  { %v173_v26 = vadd.f32 1.0, %v262_v25 }
 0x11a   :  { %265 = vrcp.f32 %v173_v26 }
 0x123   :  { %v264_v27 = vpop.eup %263 }
 0x124   :  { %v178_v28 = vmul.f32 %v264_v27, %v260_v23 }
 0x126   :  { %v180_v29 = vsel %vm176_vm1, %v264_v27, %v178_v28 }
 0x127   :  { %v266_v30 = vpop.eup %265  ;;  %182 = vst [vmem:[#allocation7] sm:$0xff] %v180_v29 }
 0x128   :  { %v179_v31 = vmul.f32 %v266_v30, %v262_v25 }
 0x12a   :  { %v181_v32 = vsel %vm177_vm2, %v266_v30, %v179_v31 }
 0x12b   :  { %183 = vst [vmem:[#allocation7 + $0x8] sm:$0xff] %v181_v32 }
 0x12c   :  { %318 = shalt.err (!%p315_p0)
}
 0x12d   :  { %s340_s26 = smov 128   ;;  %s341_s27 = smov 8  }
 0x12e   :  { %195 = dma.vmem_to_hbm [thread:$0]  %s190_s24, 256, %s377_s3, [#allocation4], %s340_s26, %s340_s26, %s341_s27  }
 0x12f   :  { %331 = dma.done.wait [#allocation4], 256  }
 0x130   :  { %332 = vsyncadd [#allocation4], 4294967040 }
 0x131   :  { %199 = vsyncpa [#allocation3], 1 }
 0x132   :  { %200 = vsyncpa [#allocation6], 1 }
 0x133   :  { %201 = vsyncpa [#allocation4], 1 }

</bundles_post_ra>
